<compile_context>
chip_gen: v5e
topology: v5e:2x2
jax: 0.10.0
libtpu: 0.0.40
codegen_flags: <defaults>
</compile_context>

<pallas_src>
import numpy as np
import jax
import jax.numpy as jnp
from jax import lax
from jax.experimental import pallas as pl
from jax.experimental.pallas import tpu as pltpu


def _round_up(x, m):
    return (x + m - 1) // m * m


# ---------------------------------------------------------------------------
# erf built only from ops that lower cleanly in Mosaic (exp / mul / add /
# reciprocal / where).  Abramowitz & Stegun 7.1.26, |poly err| <= 1.5e-7.
# The divide is a single EUP approximate reciprocal (review: Newton dropped).
# ---------------------------------------------------------------------------
def _erf_f32(x):
    a1, a2, a3, a4, a5 = (0.254829592, -0.284496736, 1.421413741,
                          -1.453152027, 1.061405429)
    p = 0.3275911
    ax = jnp.abs(x)
    t = pl.reciprocal(1.0 + p * ax, approx=True)          # EUP slot, no Newton
    poly = ((((a5 * t + a4) * t + a3) * t + a2) * t + a1) * t
    y = 1.0 - poly * jnp.exp(-ax * ax)
    return jnp.where(x < 0, -y, y)


def _gelu(v):
    # Mirrors the PyTorch graph: (v * 0.5) * (erf(v * 0.7071067811865476) + 1)
    return (v * 0.5) * (_erf_f32(v * 0.7071067811865476) + 1.0)


# ---------------------------------------------------------------------------
# conv1: direct (tap-accumulation) conv + fused GELU.  Specialised to
# stride (1, 1); dilation only shifts the static lane offsets.
#   w_ref : SMEM, flat (Cout*Cin*KH*KW,) scalars
#   x_ref : VMEM (Cin, 1, H_alloc, W_alloc) — whole padded image, resident
#   o_ref : VMEM (Cout, 1, TR, OWL) — one output row block, lane-dense
# ---------------------------------------------------------------------------
def _make_conv1_kernel(cin, cout, kh, kw, dw, tr, owl):
    def kernel(w_ref, x_ref, o_ref):
        r = pl.program_id(1)
        row0 = pl.multiple_of(r * tr, tr)

        def tap_row(i, accs):                       # i = kernel row (0..kh-1)
            accs = list(accs)
            for ci in range(cin):
                # (tr, W_alloc) input band for this (kernel row, channel)
                rows = x_ref[ci, 0, pl.ds(row0 + i, tr), :]
                for j in range(kw):
                    c0 = j * dw                     # static lane offset
                    sl = rows[:, c0:c0 + owl]       # (tr, owl), contiguous
                    for co in range(cout):
                        w = w_ref[(co * cin + ci) * (kh * kw) + i * kw + j]
                        accs[co] = accs[co] + w * sl
            return tuple(accs)

        init = tuple(jnp.zeros((tr, owl), jnp.float32) for _ in range(cout))
        accs = lax.fori_loop(0, kh, tap_row, init)
        out = _gelu(jnp.stack(accs, axis=0))        # (cout, tr, owl), full vregs
        o_ref[...] = out[:, None, :, :]
    return kernel


def conv1_gelu(x_cnhw, w_oihw, *, padding, dilation, tr=32):
    cin, n, h, w = x_cnhw.shape
    cout, cin_w, kh, kw = w_oihw.shape
    assert cin == cin_w
    ph, pw = padding
    dh, dw = dilation                               # stride is (1, 1) here
    assert dh == 1
    eff_kh = (kh - 1) * dh + 1
    eff_kw = (kw - 1) * dw + 1
    oh = h + 2 * ph - eff_kh + 1
    ow = w + 2 * pw - eff_kw + 1
    assert oh > 0 and ow > 0

    tr = min(tr, _round_up(oh, 8))                  # sublane-multiple row tile
    r_blocks = pl.cdiv(oh, tr)
    owl = _round_up(ow, 128)                        # lane-dense output width
    h_alloc = r_blocks * tr + (kh - 1) * dh         # covers all tap rows
    w_alloc = owl + _round_up((kw - 1) * dw, 128)   # covers all tap columns

    # Zero-pad once in the wrapper (zeros also cover the ragged tile tails, so
    # every stored lane is finite — no NaNs from exp on garbage).
    xp = jnp.pad(x_cnhw.astype(jnp.float32),
                 ((0, 0), (0, 0), (ph, h_alloc - h - ph), (pw, w_alloc - w - pw)))
    w_flat = w_oihw.astype(jnp.float32).reshape(-1)

    # Per-(n) resident input block: ~6.9 MB at the original (1,3,1099,287) size,
    # x2 buffers well under the 32 MiB scoped-VMEM default on v5e/v6e/v7x.
    out_elems = cout * n * r_blocks * tr * owl
    out = pl.pallas_call(
        _make_conv1_kernel(cin, cout, kh, kw, dw, tr, owl),
        out_shape=jax.ShapeDtypeStruct((cout, n, r_blocks * tr, owl), jnp.float32),
        grid=(n, r_blocks),
        in_specs=[
            pl.BlockSpec(memory_space=pltpu.MemorySpace.SMEM),        # weights
            pl.BlockSpec((cin, 1, h_alloc, w_alloc), lambda b, r: (0, b, 0, 0)),
        ],
        out_specs=pl.BlockSpec((cout, 1, tr, owl), lambda b, r: (0, b, r, 0)),
        compiler_params=pltpu.CompilerParams(
            dimension_semantics=("parallel", "parallel")),
        cost_estimate=pl.CostEstimate(
            flops=2 * cin * kh * kw * out_elems,
            transcendentals=out_elems,
            bytes_accessed=4 * (xp.size + out_elems + w_flat.size)),
    )(w_flat, xp)
    return out[:, :, :oh, :ow]


# ---------------------------------------------------------------------------
# im2col helper (wrapper-side layout plumbing) used by the GEMM-path layers.
# K ordering is (kh, kw, cin), matching the (0,2,3,1) weight transpose.
# ---------------------------------------------------------------------------
def _im2col_cnhw(x_cnhw, kh, kw, *, padding, stride, dilation):
    cin, n, h, w = x_cnhw.shape
    ph, pw = padding
    sh, sw = stride
    dh, dw = dilation
    eff_kh = (kh - 1) * dh + 1
    eff_kw = (kw - 1) * dw + 1
    oh = (h + 2 * ph - eff_kh) // sh + 1
    ow = (w + 2 * pw - eff_kw) // sw + 1
    assert oh > 0 and ow > 0
    xp = jnp.pad(x_cnhw, ((0, 0), (0, 0), (ph, ph), (pw, pw)))
    slabs = []
    for i in range(kh):
        for j in range(kw):
            h0, w0 = i * dh, j * dw
            slabs.append(lax.slice(
                xp, (0, 0, h0, w0),
                (cin, n, h0 + (oh - 1) * sh + 1, w0 + (ow - 1) * sw + 1),
                (1, 1, sh, sw)))
    cols = jnp.stack(slabs, axis=0).reshape(kh * kw * cin, n * oh * ow)
    return cols, oh, ow


def _pick_m_tiling(m, k, *, bytes_per=4, tm_cap=2048, vmem_budget=24 << 20):
    """Lane tile for the GEMM path: multiple of 128, double-buffered x block
    capped at ~24 MiB (v7x-safe), grid split >= 2 when M allows (v7x 2 TCs)."""
    m128 = _round_up(max(m, 1), 128)
    cap = max(128, (vmem_budget // (2 * k * bytes_per)) // 128 * 128)
    tm = min(tm_cap, cap, m128)
    grid_m = pl.cdiv(m128, tm)
    if grid_m == 1 and m128 >= 256:
        grid_m = 2
    tm = _round_up(pl.cdiv(m128, grid_m), 128)
    return tm, grid_m, tm * grid_m


# ---------------------------------------------------------------------------
# conv2 GEMM + fused GELU + conv3 (1x1, 5x2) channel mix + GELU epilogue.
# ---------------------------------------------------------------------------
def _conv23_kernel(w2_ref, w3_ref, x_ref, o_ref):
    acc = jnp.dot(w2_ref[...], x_ref[...],
                  preferred_element_type=jnp.float32)        # (2, TM)  MXU
    u = _gelu(acc)
    w3 = w3_ref[...]                                         # (5, 2)
    # 5x2 projection as VPU broadcast multiply-adds (kept off the MXU).
    out = w3[:, 0:1] * u[0:1, :] + w3[:, 1:2] * u[1:2, :]    # (5, TM)
    o_ref[...] = _gelu(out)


def conv2_gelu_conv3_gelu(x_cnhw, w2_oihw, w3_oihw):
    cin, n, _, _ = x_cnhw.shape
    cout2, _, kh, kw = w2_oihw.shape
    cout3 = w3_oihw.shape[0]
    cols, oh2, ow2 = _im2col_cnhw(x_cnhw, kh, kw, padding=(8, 9),
                                  stride=(1, 52), dilation=(1, 1))
    k, m = cols.shape
    tm, grid_m, m_pad = _pick_m_tiling(m, k)
    cols = jnp.pad(cols, ((0, 0), (0, m_pad - m)))           # zeros -> gelu(0)=0
    w2_mat = jnp.transpose(w2_oihw.astype(jnp.float32), (0, 2, 3, 1)).reshape(cout2, k)
    w3_mat = w3_oihw.astype(jnp.float32).reshape(cout3, cout2)

    out = pl.pallas_call(
        _conv23_kernel,
        out_shape=jax.ShapeDtypeStruct((cout3, m_pad), jnp.float32),
        grid=(grid_m,),
        in_specs=[
            pl.BlockSpec((cout2, k), lambda i: (0, 0)),
            pl.BlockSpec((cout3, cout2), lambda i: (0, 0)),
            pl.BlockSpec((k, tm), lambda i: (0, i)),
        ],
        out_specs=pl.BlockSpec((cout3, tm), lambda i: (0, i)),
        compiler_params=pltpu.CompilerParams(dimension_semantics=("parallel",)),
        cost_estimate=pl.CostEstimate(
            flops=2 * m_pad * (cout2 * k + cout3 * cout2),
            transcendentals=(cout2 + cout3) * m_pad,
            bytes_accessed=4 * (k * m_pad + cout2 * k + cout3 * cout2 + cout3 * m_pad)),
    )(w2_mat, w3_mat, cols)

    core = out[:, :m].reshape(cout3, n, oh2, ow2)            # GELU(conv3 core)
    # conv3: k=1, pad (5,3), stride (35,1), dilation irrelevant for k=1.
    # Padded positions give W3 @ 0 = 0 and gelu(0) = 0, so a zero canvas around
    # the GELU'd core followed by the stride decimation is exact.
    oh3 = (oh2 + 2 * 5 - 1) // 35 + 1
    ow3 = (ow2 + 2 * 3 - 1) // 1 + 1
    canvas = jnp.pad(core, ((0, 0), (0, 0), (5, 5), (3, 3)))
    v18 = lax.slice(canvas, (0, 0, 0, 0),
                    (cout3, n, (oh3 - 1) * 35 + 1, ow3), (1, 1, 35, 1))
    return v18                                               # already GELU'd


# ---------------------------------------------------------------------------
# conv4: small im2col GEMM (no activation).
# ---------------------------------------------------------------------------
def _gemm_kernel(w_ref, x_ref, o_ref):
    o_ref[...] = jnp.dot(w_ref[...], x_ref[...],
                         preferred_element_type=jnp.float32)


def conv4_im2col(x_cnhw, w4_oihw):
    cin, n, _, _ = x_cnhw.shape
    cout, _, kh, kw = w4_oihw.shape
    cols, oh4, ow4 = _im2col_cnhw(x_cnhw, kh, kw, padding=(17, 14),
                                  stride=(1, 52), dilation=(1, 3))
    k, m = cols.shape
    tm, grid_m, m_pad = _pick_m_tiling(m, k)
    cols = jnp.pad(cols, ((0, 0), (0, m_pad - m)))
    w_mat = jnp.transpose(w4_oihw.astype(jnp.float32), (0, 2, 3, 1)).reshape(cout, k)
    out = pl.pallas_call(
        _gemm_kernel,
        out_shape=jax.ShapeDtypeStruct((cout, m_pad), jnp.float32),
        grid=(grid_m,),
        in_specs=[pl.BlockSpec((cout, k), lambda i: (0, 0)),
                  pl.BlockSpec((k, tm), lambda i: (0, i))],
        out_specs=pl.BlockSpec((cout, tm), lambda i: (0, i)),
        compiler_params=pltpu.CompilerParams(dimension_semantics=("parallel",)),
        cost_estimate=pl.CostEstimate(
            flops=2 * cout * k * m_pad, transcendentals=0,
            bytes_accessed=4 * (k * m_pad + cout * k + cout * m_pad)),
    )(w_mat, cols)
    return out[:, :m].reshape(cout, n, oh4, ow4)


# ---------------------------------------------------------------------------
# Model (deterministic init, matching nn.Conv2d default bound 1/sqrt(fan_in))
# ---------------------------------------------------------------------------
class PallasModel:
    def __init__(self, key):
        k1, k2, k3, k4 = jax.random.split(key, 4)

        def init(k, cout, cin, ksz):
            bound = 1.0 / np.sqrt(cin * ksz * ksz)
            return jax.random.uniform(k, (cout, cin, ksz, ksz),
                                      jnp.float32, -bound, bound)

        self.w1 = init(k1, 8, 3, 11)
        self.w2 = init(k2, 2, 8, 11)
        self.w3 = init(k3, 5, 2, 1)
        # TODO(synk): original conv4 kernel_size=1099 makes the module unrunnable
        # for any reachable feature-map size; substituted kernel_size=3.
        self.w4 = init(k4, 4, 5, 3)
        self._jit_forward = jax.jit(self._forward)

    def _forward(self, x_nchw):
        # Single internal layout (C, N, H, W); convert only at the boundaries.
        x = jnp.transpose(x_nchw, (1, 0, 2, 3)).astype(jnp.float32)
        x = conv1_gelu(x, self.w1, padding=(9, 10), dilation=(1, 2))
        x = conv2_gelu_conv3_gelu(x, self.w2, self.w3)
        x = conv4_im2col(x, self.w4)
        return jnp.transpose(x, (1, 0, 2, 3))                # back to NCHW

    def __call__(self, x):
        return self._jit_forward(x)


# ---------------------------------------------------------------------------
# Pure-JAX reference (lax.conv + true erf) for the correctness check.
# ---------------------------------------------------------------------------
def _ref_conv(x, w, padding, stride, dilation):
    return lax.conv_general_dilated(
        x, w, window_strides=stride,
        padding=[(padding[0], padding[0]), (padding[1], padding[1])],
        rhs_dilation=dilation,
        dimension_numbers=('NCHW', 'OIHW', 'NCHW'),
        precision=lax.Precision.HIGHEST)


def _ref_gelu(x):
    return (x * 0.5) * (jax.scipy.special.erf(x * 0.7071067811865476) + 1.0)


def reference_forward(x, m):
    v = _ref_gelu(_ref_conv(x, m.w1, (9, 10), (1, 1), (1, 2)))
    v = _ref_gelu(_ref_conv(v, m.w2, (8, 9), (1, 52), (1, 1)))
    v = _ref_gelu(_ref_conv(v, m.w3, (5, 3), (35, 1), (1, 2)))
    return _ref_conv(v, m.w4, (17, 14), (1, 52), (1, 3))


if __name__ == "__main__":
    key = jax.random.PRNGKey(0)
    kx, kp = jax.random.split(key)
    # Small input consistent with the module's in_channels=3 (orig: (1,3,1099,287))
    x1 = jax.random.normal(kx, (2, 3, 24, 32), jnp.float32)

    model = PallasModel(kp)
    out = jax.block_until_ready(model(x1))

    ref = jax.block_until_ready(reference_forward(x1, model))
    assert out.shape == ref.shape, (out.shape, ref.shape)
    max_err = float(jnp.max(jnp.abs(out - ref)))
    assert jnp.allclose(out, ref, rtol=2e-3, atol=2e-3), max_err

    print("KERNEL_OK")
</pallas_src>

<mosaic_0001>
module attributes {stable_mosaic.version = 11 : i64} {
  func.func @_gemm_kernel(%arg0: i32, %arg1: memref<4x45xf32, #tpu.memory_space<vmem>>, %arg2: memref<45x128xf32, #tpu.memory_space<vmem>>, %arg3: memref<4x128xf32, #tpu.memory_space<vmem>>) attributes {dimension_semantics = [#tpu.dimension_semantics<parallel>], iteration_bounds = array<i64: 1>, scalar_prefetch = 0 : i64, scratch_operands = 0 : i64, tpu.core_type = #tpu.core_type<tc>, window_params = [{pipeline_mode = #tpu.pipeline_mode<synchronous>, transform_indices = @transform_0, window_bounds = array<i64: 4, 45>}, {transform_indices = @transform_1, window_bounds = array<i64: 45, 128>}, {transform_indices = @transform_2, window_bounds = array<i64: 4, 128>}]} {
    %c0 = arith.constant 0 : index
    %c0_0 = arith.constant 0 : index
    %0 = vector.load %arg1[%c0, %c0_0] : memref<4x45xf32, #tpu.memory_space<vmem>>, vector<4x45xf32>
    %c0_1 = arith.constant 0 : index
    %c0_2 = arith.constant 0 : index
    %1 = vector.load %arg2[%c0_1, %c0_2] : memref<45x128xf32, #tpu.memory_space<vmem>>, vector<45x128xf32>
    %cst = arith.constant dense<0.000000e+00> : vector<4x128xf32>
    %2 = tpu.matmul %0, %1, %cst {dimension_numbers = #tpu.dot_dimension_numbers<[1], [0], [0], [1], [0, 0, 1, 1], [], []>} : vector<4x45xf32>, vector<45x128xf32>, vector<4x128xf32> -> vector<4x128xf32>
    %c0_3 = arith.constant 0 : index
    %c0_4 = arith.constant 0 : index
    %3 = vector.load %arg3[%c0_3, %c0_4] : memref<4x128xf32, #tpu.memory_space<vmem>>, vector<4x128xf32>
    tpu.vector_store %arg3[%c0_3, %c0_4], %2 {strides = array<i32>} : memref<4x128xf32, #tpu.memory_space<vmem>>, vector<4x128xf32>,
    return
  }
  func.func @transform_0(%arg0: i32) -> (i32, i32) {
    %c0_i32 = arith.constant 0 : i32
    %c0_i32_0 = arith.constant 0 : i32
    %c0_i32_1 = arith.constant 0 : i32
    return %c0_i32, %c0_i32_0 : i32, i32
  }
  func.func @transform_1(%arg0: i32) -> (i32, i32) {
    %c0_i32 = arith.constant 0 : i32
    %c0_i32_0 = arith.constant 0 : i32
    return %c0_i32, %arg0 : i32, i32
  }
  func.func @transform_2(%arg0: i32) -> (i32, i32) {
    %c0_i32 = arith.constant 0 : i32
    %c0_i32_0 = arith.constant 0 : i32
    return %c0_i32, %arg0 : i32, i32
  }
}

</mosaic_0001>

<bundles_post_ra>
// kernel: _forward.3
= control target key start
LH: loop header
LB: loop body
LE: loop exit
PB: predicated region body
PF: predicated region fallthrough
CT: control target
= control target key end

     0   :  { %vm22_vm0 = vcmask 1044480   ;;  %vm18_vm1 = vcmask 367616   ;;  %s92_s1 = inlined_call_operand.vmem [shape: f32[45,128], index: 1, kind: input, shape index: {}]   ;;  %s93_s0 = inlined_call_operand.vmem [shape: f32[4,45], index: 0, kind: input, shape index: {}]   ;;  %s94_s2 = inlined_call_operand.vmem [shape: f32[4,128], index: 2, kind: output, shape index: {}]  }
   0x1   :  { %v17_v0 = vld [vmem:[%s92_s1 + $0x28] sm:$0x1f]  ;;  %v16_v1 = vld [vmem:[%s92_s1 + $0x20] sm:$0xff]  ;;  %v15_v2 = vld [vmem:[%s92_s1 + $0x18] sm:$0xff] }
   0x2   :  { %51 = vmatpush.msk.msra.mxu0 %vm22_vm0, %v17_v0  ;;  %v14_v3 = vld [vmem:[%s92_s1 + $0x10] sm:$0xff]  ;;  %v13_v4 = vld [vmem:[%s92_s1 + $0x8] sm:$0xff]  ;;  %v12_v5 = vld [vmem:[%s92_s1] sm:$0xff] }
   0x3   :  { %v11_v6 = vld [vmem:[%s93_s0] sm:$0xf] }
   0x4   :  { %37 = vmatpush.msra.mxu0 %v16_v1 }
   0x6   :  { %38 = vmatpush.msra.mxu0 %v15_v2 }
   0x8   :  { %39 = vmatpush.msra.mxu0 %v14_v3 }
   0xa   :  { %40 = vmatpush.msra.mxu0 %v13_v4 }
   0xc   :  { %41 = vmatpush.msra.mxu0 %v12_v5 }
   0xd   :  { %52 = vmatmul.msk.f32.vlgmr.msra.gmra.mxu0 %vm18_vm1, %v11_v6 }
  0x8a   :  { %v43_v7 = vpop.f32.mrf.mxu0 }
  0x8b   :  { %46 = vst [vmem:[%s94_s2] sm:$0xf] %v43_v7 }

</bundles_post_ra>
